<compile_context>
chip_gen: v5e
topology: v5e:2x2
jax: 0.10.0
libtpu: 0.0.40
codegen_flags: <defaults>
</compile_context>

<pallas_src>
import jax
import jax.numpy as jnp
from jax.experimental import pallas as pl
from jax.experimental.pallas import tpu as pltpu

_NEG = -1e30  # bias for padded vocab lanes (exp underflows to 0)


def _round_up(x, m):
    return (x + m - 1) // m * m


# ----------------------------------------------------------------------------
# Pass 1: serial GRU recurrence.
# ----------------------------------------------------------------------------
def gru_recurrence_kernel(x_ref,        # (T_pad, H_pad) bf16  embedded inputs (resident)
                          h0_ref,       # (1, H_pad)     f32   initial hidden
                          w_ih_ref,     # (H_pad, GW)    bf16  resident
                          w_hh_ref,     # (H_pad, GW)    bf16  resident
                          b_ih_ref,     # (1, GW)        f32
                          b_hh_ref,     # (1, GW)        f32
                          h_out_ref,    # (1, 1, H_pad)  f32   per-step output block
                          h_scr,        # VMEM (1, H_pad)  f32  recurrent state
                          gi_scr):      # VMEM (T_pad, GW) f32  precomputed input gates
    t = pl.program_id(0)
    H = h_scr.shape[1]  # padded hidden width (gate stride)

    @pl.when(t == 0)
    def _prologue():
        # Input-to-hidden projection for ALL steps: one batched M=T matmul,
        # hoisted off the serial per-step critical path.
        gi_scr[...] = (jnp.dot(x_ref[...], w_ih_ref[...],
                               preferred_element_type=jnp.float32)
                       + b_ih_ref[...])
        h_scr[...] = h0_ref[...]

    h = h_scr[...]                                     # (1, H_pad) f32
    gi = gi_scr[pl.ds(t, 1), :]                        # (1, GW)    f32
    gh = (jnp.dot(h.astype(jnp.bfloat16), w_hh_ref[...],
                  preferred_element_type=jnp.float32)
          + b_hh_ref[...])                             # (1, GW)    f32

    # PyTorch GRU gate order: r | z | n  (gate elementwise math stays f32)
    r = jax.nn.sigmoid(gi[:, 0:H] + gh[:, 0:H])
    z = jax.nn.sigmoid(gi[:, H:2 * H] + gh[:, H:2 * H])
    n = jnp.tanh(gi[:, 2 * H:3 * H] + r * gh[:, 2 * H:3 * H])
    h_new = (1.0 - z) * n + z * h                      # (1, H_pad) f32

    h_scr[...] = h_new                                 # recurrent state stays in VMEM
    h_out_ref[...] = h_new.reshape(1, 1, H)


# ----------------------------------------------------------------------------
# Pass 2: batched output projection + log-softmax (parallel over time tiles).
# ----------------------------------------------------------------------------
def project_logsoftmax_kernel(h_ref,       # (TM, H_pad)   f32
                              w_out_ref,   # (H_pad, O_pad) bf16 (resident)
                              b_out_ref,   # (1, O_pad)     f32
                              logp_ref):   # (TM, O_pad)    f32, lane-dense
    logits = (jnp.dot(h_ref[...].astype(jnp.bfloat16), w_out_ref[...],
                      preferred_element_type=jnp.float32)
              + b_out_ref[...])
    m = jnp.max(logits, axis=1, keepdims=True)
    lse = m + jnp.log(jnp.sum(jnp.exp(logits - m), axis=1, keepdims=True))
    logp_ref[...] = logits - lse


# ----------------------------------------------------------------------------
# Parameter preparation: pad to lane-aligned shapes, cast weights to bf16.
# ----------------------------------------------------------------------------
def init_params(key, input_size, hidden_size, output_size):
    """Parameters in 'math' orientation: x @ W + b (PyTorch weights transposed)."""
    ks = jax.random.split(key, 7)
    k = 1.0 / jnp.sqrt(hidden_size)
    emb = jax.random.normal(ks[0], (input_size, hidden_size), jnp.float32)
    w_ih = jax.random.uniform(ks[1], (hidden_size, 3 * hidden_size), jnp.float32, -k, k)
    w_hh = jax.random.uniform(ks[2], (hidden_size, 3 * hidden_size), jnp.float32, -k, k)
    b_ih = jax.random.uniform(ks[3], (1, 3 * hidden_size), jnp.float32, -k, k)
    b_hh = jax.random.uniform(ks[4], (1, 3 * hidden_size), jnp.float32, -k, k)
    w_out = jax.random.uniform(ks[5], (hidden_size, output_size), jnp.float32, -k, k)
    b_out = jax.random.uniform(ks[6], (1, output_size), jnp.float32, -k, k)
    return emb, w_ih, w_hh, b_ih, b_hh, w_out, b_out


def prepare_params(params):
    emb, w_ih, w_hh, b_ih, b_hh, w_out, b_out = params
    V, H = emb.shape
    O = w_out.shape[1]
    H_pad = _round_up(H, 128)
    GW = _round_up(3 * H_pad, 256)        # full 256-wide MXU passes on v6e/v7x
    O_pad = _round_up(O, 128)
    assert O_pad - O < 128, "a fully-padded vocab tile would need masking"

    def pad_gates_w(w):   # (H, 3H) -> (H_pad, GW), each gate padded separately
        gs = jnp.split(w, 3, axis=1)
        gs = [jnp.pad(g, ((0, H_pad - H), (0, H_pad - H))) for g in gs]
        w3 = jnp.concatenate(gs, axis=1)              # (H_pad, 3*H_pad)
        return jnp.pad(w3, ((0, 0), (0, GW - 3 * H_pad)))

    def pad_gates_b(b):   # (1, 3H) -> (1, GW)
        gs = jnp.split(b, 3, axis=1)
        gs = [jnp.pad(g, ((0, 0), (0, H_pad - H))) for g in gs]
        b3 = jnp.concatenate(gs, axis=1)
        return jnp.pad(b3, ((0, 0), (0, GW - 3 * H_pad)))

    return {
        "emb": jnp.pad(emb, ((0, 0), (0, H_pad - H))).astype(jnp.bfloat16),
        "w_ih": pad_gates_w(w_ih).astype(jnp.bfloat16),
        "w_hh": pad_gates_w(w_hh).astype(jnp.bfloat16),
        "b_ih": pad_gates_b(b_ih).astype(jnp.float32),
        "b_hh": pad_gates_b(b_hh).astype(jnp.float32),
        "w_out": jnp.pad(w_out, ((0, H_pad - H), (0, O_pad - O))).astype(jnp.bfloat16),
        "b_out": jnp.pad(b_out, ((0, 0), (0, O_pad - O)),
                         constant_values=_NEG).astype(jnp.float32),
        "H": H, "O": O, "H_pad": H_pad, "GW": GW, "O_pad": O_pad,
    }


# ----------------------------------------------------------------------------
# Wrappers
# ----------------------------------------------------------------------------
def chatbot_decode(tokens, hidden, p):
    """Run T forward steps (== T sequential Chatbot.forward calls).

    tokens: (T,) int32, hidden: (1,1,H) f32.
    Returns (log_probs (T, O), hiddens (T, H)).
    """
    H, O = p["H"], p["O"]
    H_pad, GW, O_pad = p["H_pad"], p["GW"], p["O_pad"]
    tokens = jnp.asarray(tokens, jnp.int32)
    T = int(tokens.shape[0])

    # Time-tile size for pass 2 (sublane axis must be a multiple of 8).
    if T <= 128:
        TM = _round_up(T, 8)
        T_pad = TM
    else:
        TM = 128
        T_pad = _round_up(T, 128)

    # One XLA gather for the whole sequence instead of T tiny per-step DMAs.
    x = jnp.take(p["emb"], tokens, axis=0)             # (T, H_pad) bf16
    x = jnp.pad(x, ((0, T_pad - T), (0, 0)))           # (T_pad, H_pad)

    h0 = jnp.zeros((1, H_pad), jnp.float32).at[:, :H].set(
        hidden.reshape(1, H).astype(jnp.float32))

    # ---- pass 1: serial GRU recurrence --------------------------------------
    # NOTE: the constant-index resident weight blocks could be single-buffered
    # (pipeline_mode=pl.Buffered(1)) when H is scaled up; kept at the default
    # here since their footprint is tiny.
    h_steps = pl.pallas_call(
        gru_recurrence_kernel,
        out_shape=jax.ShapeDtypeStruct((T, 1, H_pad), jnp.float32),
        grid_spec=pltpu.PrefetchScalarGridSpec(
            num_scalar_prefetch=0,
            grid=(T,),
            in_specs=[
                pl.BlockSpec((T_pad, H_pad), lambda t: (0, 0)),   # x (resident)
                pl.BlockSpec((1, H_pad), lambda t: (0, 0)),       # h0
                pl.BlockSpec((H_pad, GW), lambda t: (0, 0)),      # w_ih (resident)
                pl.BlockSpec((H_pad, GW), lambda t: (0, 0)),      # w_hh (resident)
                pl.BlockSpec((1, GW), lambda t: (0, 0)),          # b_ih
                pl.BlockSpec((1, GW), lambda t: (0, 0)),          # b_hh
            ],
            out_specs=pl.BlockSpec((1, 1, H_pad), lambda t: (t, 0, 0)),
            scratch_shapes=[
                pltpu.VMEM((1, H_pad), jnp.float32),    # recurrent hidden state
                pltpu.VMEM((T_pad, GW), jnp.float32),   # precomputed input gates
            ]),
        compiler_params=pltpu.CompilerParams(
            dimension_semantics=("arbitrary",)),        # true recurrence
    )(x, h0, p["w_ih"], p["w_hh"], p["b_ih"], p["b_hh"])

    hiddens = h_steps.reshape(T, H_pad)
    h2d = jnp.pad(hiddens, ((0, T_pad - T), (0, 0)))    # (T_pad, H_pad)

    # ---- pass 2: batched projection + log-softmax ----------------------------
    # w_out is streamed from HBM once and stays VMEM-resident across time tiles.
    # TODO(synk): for very large vocabularies, tile w_out over the vocab axis
    # with an online log-sum-exp so H_pad*O_pad*2B stays within v7x's 64 MiB VMEM.
    logp_pad = pl.pallas_call(
        project_logsoftmax_kernel,
        out_shape=jax.ShapeDtypeStruct((T_pad, O_pad), jnp.float32),
        grid_spec=pltpu.PrefetchScalarGridSpec(
            num_scalar_prefetch=0,
            grid=(T_pad // TM,),
            in_specs=[
                pl.BlockSpec((TM, H_pad), lambda i: (i, 0)),      # hidden tile
                pl.BlockSpec((H_pad, O_pad), lambda i: (0, 0)),   # w_out (resident)
                pl.BlockSpec((1, O_pad), lambda i: (0, 0)),       # b_out
            ],
            out_specs=pl.BlockSpec((TM, O_pad), lambda i: (i, 0)),  # lane-dense
        ),
        compiler_params=pltpu.CompilerParams(
            dimension_semantics=("parallel",)),          # megacore-friendly (v7x)
    )(h2d, p["w_out"], p["b_out"])

    return logp_pad[:T, :O], hiddens[:, :H]


def chatbot_forward(token, hidden, p):
    """Single-step API matching Chatbot.forward: returns ((1,O) log-probs, (1,1,H))."""
    logp, hiddens = chatbot_decode(jnp.asarray(token, jnp.int32).reshape(1), hidden, p)
    H = hiddens.shape[1]
    return logp, hiddens.reshape(1, 1, H)


# ----------------------------------------------------------------------------
# Pure-JAX reference (same bf16 weights) for correctness checking
# ----------------------------------------------------------------------------
def reference_decode(tokens, hidden, p):
    H, O, H_pad = p["H"], p["O"], p["H_pad"]
    h0 = jnp.zeros((1, H_pad), jnp.float32).at[:, :H].set(
        hidden.reshape(1, H).astype(jnp.float32))
    x_all = jnp.take(p["emb"], jnp.asarray(tokens, jnp.int32), axis=0)

    def step(h, x):
        gi = jnp.dot(x.reshape(1, H_pad), p["w_ih"],
                     preferred_element_type=jnp.float32) + p["b_ih"]
        gh = jnp.dot(h.astype(jnp.bfloat16), p["w_hh"],
                     preferred_element_type=jnp.float32) + p["b_hh"]
        r = jax.nn.sigmoid(gi[:, :H_pad] + gh[:, :H_pad])
        z = jax.nn.sigmoid(gi[:, H_pad:2 * H_pad] + gh[:, H_pad:2 * H_pad])
        n = jnp.tanh(gi[:, 2 * H_pad:3 * H_pad] + r * gh[:, 2 * H_pad:3 * H_pad])
        h_new = (1.0 - z) * n + z * h
        logits = jnp.dot(h_new.astype(jnp.bfloat16), p["w_out"],
                         preferred_element_type=jnp.float32) + p["b_out"]
        return h_new, (jax.nn.log_softmax(logits, axis=1)[0], h_new[0])

    _, (logps, hs) = jax.lax.scan(step, h0, x_all)
    return logps[:, :O], hs[:, :H]


if __name__ == "__main__":
    input_size, hidden_size, output_size = 384, 128, 256   # lane-aligned H / O
    T = 6

    key = jax.random.PRNGKey(0)
    pkey, tkey = jax.random.split(key)
    params = init_params(pkey, input_size, hidden_size, output_size)
    prepared = prepare_params(params)

    tokens = jax.random.randint(tkey, (T,), 0, input_size, dtype=jnp.int32)
    hidden0 = jnp.zeros((1, 1, hidden_size), jnp.float32)   # Chatbot.initHidden()

    # full decode loop (GRU recurrence kernel + batched projection kernel)
    logp, hiddens = chatbot_decode(tokens, hidden0, prepared)
    jax.block_until_ready((logp, hiddens))

    # single-step API identical to Chatbot.forward(input, hidden)
    logp0, h1 = chatbot_forward(tokens[0], hidden0, prepared)
    jax.block_until_ready((logp0, h1))

    assert logp.shape == (T, output_size)
    assert hiddens.shape == (T, hidden_size)
    assert logp0.shape == (1, output_size) and h1.shape == (1, 1, hidden_size)

    # log-softmax sanity: probabilities sum to ~1 per step
    assert jnp.allclose(jnp.exp(logp).sum(axis=1), 1.0, atol=1e-4)

    # match the pure-JAX reference using the same bf16 weights
    ref_logp, ref_h = reference_decode(tokens, hidden0, prepared)
    assert jnp.allclose(logp, ref_logp, atol=2e-3, rtol=2e-3)
    assert jnp.allclose(hiddens, ref_h, atol=2e-3, rtol=2e-3)
    assert jnp.allclose(logp0, ref_logp[0:1], atol=2e-3, rtol=2e-3)

    print("KERNEL_OK")
</pallas_src>

<mosaic_0001>
module attributes {stable_mosaic.version = 11 : i64} {
  func.func @gru_recurrence_kernel(%arg0: i32, %arg1: memref<8x128xbf16, #tpu.memory_space<vmem>>, %arg2: memref<1x128xf32, #tpu.memory_space<vmem>>, %arg3: memref<128x512xbf16, #tpu.memory_space<vmem>>, %arg4: memref<128x512xbf16, #tpu.memory_space<vmem>>, %arg5: memref<1x512xf32, #tpu.memory_space<vmem>>, %arg6: memref<1x512xf32, #tpu.memory_space<vmem>>, %arg7: memref<1x1x128xf32, #tpu.memory_space<vmem>>, %arg8: memref<1x128xf32, #tpu.memory_space<vmem>>, %arg9: memref<8x512xf32, #tpu.memory_space<vmem>>) attributes {dimension_semantics = [#tpu.dimension_semantics<arbitrary>], iteration_bounds = array<i64: 6>, scalar_prefetch = 0 : i64, scratch_operands = 2 : i64, tpu.core_type = #tpu.core_type<tc>, window_params = [{pipeline_mode = #tpu.pipeline_mode<synchronous>, transform_indices = @transform_0, window_bounds = array<i64: 8, 128>}, {pipeline_mode = #tpu.pipeline_mode<synchronous>, transform_indices = @transform_1, window_bounds = array<i64: 1, 128>}, {pipeline_mode = #tpu.pipeline_mode<synchronous>, transform_indices = @transform_2, window_bounds = array<i64: 128, 512>}, {pipeline_mode = #tpu.pipeline_mode<synchronous>, transform_indices = @transform_3, window_bounds = array<i64: 128, 512>}, {pipeline_mode = #tpu.pipeline_mode<synchronous>, transform_indices = @transform_4, window_bounds = array<i64: 1, 512>}, {pipeline_mode = #tpu.pipeline_mode<synchronous>, transform_indices = @transform_5, window_bounds = array<i64: 1, 512>}, {transform_indices = @transform_6, window_bounds = array<i64: 1, 1, 128>}]} {
    %c0_i32 = arith.constant 0 : i32
    %0 = arith.cmpi eq, %arg0, %c0_i32 : i32
    %1 = arith.extui %0 : i1 to i32
    %c0_i32_0 = arith.constant 0 : i32
    %2 = arith.cmpi ne, %1, %c0_i32_0 : i32
    scf.if %2 {
      %c0_15 = arith.constant 0 : index
      %c0_16 = arith.constant 0 : index
      %40 = vector.load %arg1[%c0_15, %c0_16] : memref<8x128xbf16, #tpu.memory_space<vmem>>, vector<8x128xbf16>
      %c0_17 = arith.constant 0 : index
      %c0_18 = arith.constant 0 : index
      %41 = vector.load %arg3[%c0_17, %c0_18] : memref<128x512xbf16, #tpu.memory_space<vmem>>, vector<128x512xbf16>
      %cst_19 = arith.constant dense<0.000000e+00> : vector<8x512xf32>
      %42 = tpu.matmul %40, %41, %cst_19 {dimension_numbers = #tpu.dot_dimension_numbers<[1], [0], [0], [1], [0, 0, 1, 1], [], []>} : vector<8x128xbf16>, vector<128x512xbf16>, vector<8x512xf32> -> vector<8x512xf32>
      %c0_20 = arith.constant 0 : index
      %c0_21 = arith.constant 0 : index
      %43 = vector.load %arg5[%c0_20, %c0_21] : memref<1x512xf32, #tpu.memory_space<vmem>>, vector<1x512xf32>
      %44 = vector.broadcast %43 : vector<1x512xf32> to vector<8x512xf32>
      %45 = arith.addf %42, %44 : vector<8x512xf32>
      %c0_22 = arith.constant 0 : index
      %c0_23 = arith.constant 0 : index
      %46 = vector.load %arg9[%c0_22, %c0_23] : memref<8x512xf32, #tpu.memory_space<vmem>>, vector<8x512xf32>
      tpu.vector_store %arg9[%c0_22, %c0_23], %45 {strides = array<i32>} : memref<8x512xf32, #tpu.memory_space<vmem>>, vector<8x512xf32>,
      %c0_24 = arith.constant 0 : index
      %c0_25 = arith.constant 0 : index
      %47 = vector.load %arg2[%c0_24, %c0_25] : memref<1x128xf32, #tpu.memory_space<vmem>>, vector<1x128xf32>
      %c0_26 = arith.constant 0 : index
      %c0_27 = arith.constant 0 : index
      %48 = vector.load %arg8[%c0_26, %c0_27] : memref<1x128xf32, #tpu.memory_space<vmem>>, vector<1x128xf32>
      tpu.vector_store %arg8[%c0_26, %c0_27], %47 {strides = array<i32>} : memref<1x128xf32, #tpu.memory_space<vmem>>, vector<1x128xf32>,
    } else {
    }
    %c0 = arith.constant 0 : index
    %c0_1 = arith.constant 0 : index
    %3 = vector.load %arg8[%c0, %c0_1] : memref<1x128xf32, #tpu.memory_space<vmem>>, vector<1x128xf32>
    %4 = arith.index_cast %arg0 : i32 to index
    %c0_2 = arith.constant 0 : index
    %5 = vector.load %arg9[%4, %c0_2] : memref<8x512xf32, #tpu.memory_space<vmem>>, vector<1x512xf32>
    %6 = arith.truncf %3 : vector<1x128xf32> to vector<1x128xbf16>
    %c0_3 = arith.constant 0 : index
    %c0_4 = arith.constant 0 : index
    %7 = vector.load %arg4[%c0_3, %c0_4] : memref<128x512xbf16, #tpu.memory_space<vmem>>, vector<128x512xbf16>
    %cst = arith.constant dense<0.000000e+00> : vector<1x512xf32>
    %8 = tpu.matmul %6, %7, %cst {dimension_numbers = #tpu.dot_dimension_numbers<[1], [0], [0], [1], [0, 0, 1, 1], [], []>} : vector<1x128xbf16>, vector<128x512xbf16>, vector<1x512xf32> -> vector<1x512xf32>
    %c0_5 = arith.constant 0 : index
    %c0_6 = arith.constant 0 : index
    %9 = vector.load %arg6[%c0_5, %c0_6] : memref<1x512xf32, #tpu.memory_space<vmem>>, vector<1x512xf32>
    %10 = arith.addf %8, %9 : vector<1x512xf32>
    %11 = vector.extract_strided_slice %5 {offsets = [0, 0], sizes = [1, 128], strides = [1, 1]} : vector<1x512xf32> to vector<1x128xf32>
    %12 = vector.extract_strided_slice %10 {offsets = [0, 0], sizes = [1, 128], strides = [1, 1]} : vector<1x512xf32> to vector<1x128xf32>
    %13 = arith.addf %11, %12 : vector<1x128xf32>
    %14 = arith.negf %13 : vector<1x128xf32>
    %15 = math.exp %14 : vector<1x128xf32>
    %cst_7 = arith.constant 1.000000e+00 : f32
    %16 = vector.broadcast %cst_7 : f32 to vector<1x128xf32>
    %17 = arith.addf %16, %15 : vector<1x128xf32>
    %18 = arith.divf %16, %17 : vector<1x128xf32>
    %19 = vector.extract_strided_slice %5 {offsets = [0, 128], sizes = [1, 128], strides = [1, 1]} : vector<1x512xf32> to vector<1x128xf32>
    %20 = vector.extract_strided_slice %10 {offsets = [0, 128], sizes = [1, 128], strides = [1, 1]} : vector<1x512xf32> to vector<1x128xf32>
    %21 = arith.addf %19, %20 : vector<1x128xf32>
    %22 = arith.negf %21 : vector<1x128xf32>
    %23 = math.exp %22 : vector<1x128xf32>
    %cst_8 = arith.constant 1.000000e+00 : f32
    %24 = vector.broadcast %cst_8 : f32 to vector<1x128xf32>
    %25 = arith.addf %24, %23 : vector<1x128xf32>
    %26 = arith.divf %24, %25 : vector<1x128xf32>
    %27 = vector.extract_strided_slice %5 {offsets = [0, 256], sizes = [1, 128], strides = [1, 1]} : vector<1x512xf32> to vector<1x128xf32>
    %28 = vector.extract_strided_slice %10 {offsets = [0, 256], sizes = [1, 128], strides = [1, 1]} : vector<1x512xf32> to vector<1x128xf32>
    %29 = arith.mulf %18, %28 : vector<1x128xf32>
    %30 = arith.addf %27, %29 : vector<1x128xf32>
    %31 = math.tanh %30 : vector<1x128xf32>
    %cst_9 = arith.constant 1.000000e+00 : f32
    %32 = vector.broadcast %cst_9 : f32 to vector<1x128xf32>
    %33 = arith.subf %32, %26 : vector<1x128xf32>
    %34 = arith.mulf %33, %31 : vector<1x128xf32>
    %35 = arith.mulf %26, %3 : vector<1x128xf32>
    %36 = arith.addf %34, %35 : vector<1x128xf32>
    %c0_10 = arith.constant 0 : index
    %c0_11 = arith.constant 0 : index
    %37 = vector.load %arg8[%c0_10, %c0_11] : memref<1x128xf32, #tpu.memory_space<vmem>>, vector<1x128xf32>
    tpu.vector_store %arg8[%c0_10, %c0_11], %36 {strides = array<i32>} : memref<1x128xf32, #tpu.memory_space<vmem>>, vector<1x128xf32>,
    %38 = vector.shape_cast %36 : vector<1x128xf32> to vector<1x1x128xf32>
    %c0_12 = arith.constant 0 : index
    %c0_13 = arith.constant 0 : index
    %c0_14 = arith.constant 0 : index
    %39 = vector.load %arg7[%c0_12, %c0_13, %c0_14] : memref<1x1x128xf32, #tpu.memory_space<vmem>>, vector<1x1x128xf32>
    tpu.vector_store %arg7[%c0_12, %c0_13, %c0_14], %38 {strides = array<i32>} : memref<1x1x128xf32, #tpu.memory_space<vmem>>, vector<1x1x128xf32>,
    return
  }
  func.func @transform_0(%arg0: i32) -> (i32, i32) {
    %c0_i32 = arith.constant 0 : i32
    %c0_i32_0 = arith.constant 0 : i32
    %c0_i32_1 = arith.constant 0 : i32
    return %c0_i32, %c0_i32_0 : i32, i32
  }
  func.func @transform_1(%arg0: i32) -> (i32, i32) {
    %c0_i32 = arith.constant 0 : i32
    %c0_i32_0 = arith.constant 0 : i32
    %c0_i32_1 = arith.constant 0 : i32
    return %c0_i32, %c0_i32_0 : i32, i32
  }
  func.func @transform_2(%arg0: i32) -> (i32, i32) {
    %c0_i32 = arith.constant 0 : i32
    %c0_i32_0 = arith.constant 0 : i32
    %c0_i32_1 = arith.constant 0 : i32
    return %c0_i32, %c0_i32_0 : i32, i32
  }
  func.func @transform_3(%arg0: i32) -> (i32, i32) {
    %c0_i32 = arith.constant 0 : i32
    %c0_i32_0 = arith.constant 0 : i32
    %c0_i32_1 = arith.constant 0 : i32
    return %c0_i32, %c0_i32_0 : i32, i32
  }
  func.func @transform_4(%arg0: i32) -> (i32, i32) {
    %c0_i32 = arith.constant 0 : i32
    %c0_i32_0 = arith.constant 0 : i32
    %c0_i32_1 = arith.constant 0 : i32
    return %c0_i32, %c0_i32_0 : i32, i32
  }
  func.func @transform_5(%arg0: i32) -> (i32, i32) {
    %c0_i32 = arith.constant 0 : i32
    %c0_i32_0 = arith.constant 0 : i32
    %c0_i32_1 = arith.constant 0 : i32
    return %c0_i32, %c0_i32_0 : i32, i32
  }
  func.func @transform_6(%arg0: i32) -> (i32, i32, i32) {
    %c0_i32 = arith.constant 0 : i32
    %c0_i32_0 = arith.constant 0 : i32
    %c0_i32_1 = arith.constant 0 : i32
    return %arg0, %c0_i32, %c0_i32_0 : i32, i32, i32
  }
}

</mosaic_0001>

<bundles_post_ra>
// kernel: tpu_custom_call.1
= control target key start
LH: loop header
LB: loop body
LE: loop exit
PB: predicated region body
PF: predicated region fallthrough
CT: control target
= control target key end

     0   :  { %s1776_s0 = inlined_call_operand.hbm [shape: bf16[8,128], index: 0, kind: input, shape index: {}]   ;;  %s1777_s1 = inlined_call_operand.hbm [shape: f32[1,128], index: 1, kind: input, shape index: {}]   ;;  %s1778_s2 = inlined_call_operand.hbm [shape: bf16[128,512], index: 2, kind: input, shape index: {}]   ;;  %s1779_s3 = inlined_call_operand.hbm [shape: bf16[128,512], index: 3, kind: input, shape index: {}]   ;;  %s1780_s4 = inlined_call_operand.hbm [shape: f32[1,512], index: 4, kind: input, shape index: {}]   ;;  %s1781_s5 = inlined_call_operand.vmem [shape: f32[1,512], index: 5, kind: input, shape index: {}]   ;;  %s1782_s6 = inlined_call_operand.hbm [shape: f32[6,1,128], index: 6, kind: output, shape index: {}]  }
   0x1   :  { %1783 = sst [smem:[#allocation18_spill]] %s1776_s0 }
   0x2   :  { %1784 = sst [smem:[#allocation19_spill]] %s1777_s1 }
   0x3   :  { %11 = vsyncpa [#allocation5], 0 }
   0x4   :  { %12 = vsyncpa [#allocation8], 0 }
   0x5   :  { %13 = vsyncpa [#allocation11], 0 }
   0x6   :  { %14 = vsyncpa [#allocation6], 0 }
   0x7   :  { %16 = vsyncpa [#allocation6 + $0x1], 0  ;;  %s1623_s21 = smov 0   ;;  %s1625_s22 = smov 0  }
   0x8   :  { %s1627_s23 = smov 0   ;;  %s1629_s24 = smov 0  }
   0x9 LB: > { %s1644_s25 = sadd.s32 4294967295, %s1579_s24   ;;  %s952_s26 = sadd.s32 4294967294, %s1579_s24   ;;  %s1579_s24 = sphi %s1629_s24, %s1794_s24   ;;  %s1575_s23 = sphi %s1627_s23, %s1793_s23   ;;  %s1571_s22 = sphi %s1625_s22, %s1792_s22   ;;  %s1567_s21 = sphi %s1623_s21, %s1791_s21  }
   0xa   : > { %s1648_s27 = sadd.s32 1, %s1579_s24   ;;  %s155_s28 = sadd.s32 1, %s1575_s23 }
   0xb   : > { %s152_s29 = ssub.s32 %s1579_s24, %s1648_s27  ;;  %p165_p0 = scmp.ne.s32.totalorder %s1575_s23, %s1571_s22 }
   0xc   : > { %p153_p1 = scmp.eq.s32.totalorder %s152_s29, 0  ;;  %p166_p2 = scmp.eq.s32.totalorder %s1644_s25, 5 }
   0xd   : > { %p171_p3 = scmp.ne.s32.totalorder %s1571_s22, %s1567_s21  ;;  %p172_p4 = scmp.eq.s32.totalorder %s952_s26, 5 }
   0xe   : > { %s1659_s30 = scalar_select %p153_p1, %s1575_s23, %s155_s28  }
   0xf   : > { %p1661_p5 = por %p166_p2, %p165_p0  ;;  %p1665_p6 = por %p172_p4, %p171_p3 }
  0x10   : > { %p953_p7 = scmp.ge.s32.totalorder %s1579_s24, 1  ;;  %p179_p8 = scmp.lt.s32.totalorder %s1579_s24, 7 }
  0x11   : > { %p954_p9 = scmp.ne.s32.totalorder %s1644_s25, 0  ;;  %p1295_p10 = scmp.eq.s32.totalorder %s1644_s25, 0 }
  0x12   : > { %p1673_p11 = pnand %p953_p7, %p179_p8  ;;  %s1788_s1 = sld [smem:[#allocation19_spill]] }
  0x13   : > { %s1581_s13 = smov [#allocation7]   ;;  %s228_s18 = sshll.u32 %s1779_s3, 4  ;;  %s229_s18 = int_to_ptr.hbm [resolvable:$true] %s228_s18 }
  0x14   : > { %p1275_p12 = pneg %p1673_p11  ;;  %s205_s14 = sshll.u32 %s1581_s13, 4  ;;  %s206_s14 = int_to_ptr.vmem [resolvable:$true] %s205_s14 }
  0x15   : > { %s1582_s19 = smov [#allocation10]   ;;  %s1790_s0 = sld [smem:[#allocation18_spill]] }
  0x16   : > { %p1684_p13 = pnand %p1295_p10, %p1275_p12  ;;  %s230_s20 = sshll.u32 %s1582_s19, 4  ;;  %s231_s20 = int_to_ptr.vmem [resolvable:$true] %s230_s20 }
  0x17   : > { %s1583_s10 = smov 256   ;;  %s1584_s11 = smov 16  }
  0x18   : > { %s203_s12 = sshll.u32 %s1788_s1, 4  ;;  %s214_s17 = sshll.u32 %s1778_s2, 4  ;;  %s204_s12 = int_to_ptr.hbm [resolvable:$true] %s203_s12  ;;  %s215_s17 = int_to_ptr.hbm [resolvable:$true] %s214_s17 }
  0x19   : > { %1281 = dma.hbm_to_vmem [thread:$0]  (!%p1684_p13), %s204_s12, 16, %s206_s14, [#allocation8]  }
  0x1a   : > { %1287 = dma.hbm_to_vmem [thread:$0]  (!%p1684_p13), %s229_s18, 4096, %s231_s20, [#allocation11], %s1583_s10, %s1583_s10, %s1584_s11  }
  0x1b   : > { %s191_s29 = sshll.u32 %s1790_s0, 4  ;;  %s1585_s1 = smov [#allocation4]   ;;  %s192_s29 = int_to_ptr.hbm [resolvable:$true] %s191_s29 }
  0x1c   : > { %s193_s12 = sshll.u32 %s1585_s1, 4  ;;  %s1586_s14 = smov [#allocation9]   ;;  %s194_s12 = int_to_ptr.vmem [resolvable:$true] %s193_s12 }
  0x1d   : > { %1278 = dma.hbm_to_vmem [thread:$0]  (!%p1684_p13), %s192_s29, 64, %s194_s12, [#allocation5]  }
  0x1e   : > { %s216_s19 = sshll.u32 %s1586_s14, 4  ;;  %s243_s0 = sshll.u32 %s1780_s4, 4  ;;  %s217_s19 = int_to_ptr.vmem [resolvable:$true] %s216_s19  ;;  %s244_s0 = int_to_ptr.hbm [resolvable:$true] %s243_s0 }
  0x1f   : > { %1284 = dma.hbm_to_vmem [thread:$0]  (!%p1684_p13), %s215_s17, 4096, %s217_s19, [#allocation8], %s1583_s10, %s1583_s10, %s1584_s11  }
  0x20   : > { %s1587_s18 = smov [#allocation12]   ;;  %261 = sbr.rel (%p1673_p11) target bundleno = 434 (0x1b2), region = 44 }
  0x21   : > { %s245_s20 = sshll.u32 %s1587_s18, 4  ;;  %s246_s20 = int_to_ptr.vmem [resolvable:$true] %s245_s20 }
  0x22   : > { %1290 = dma.hbm_to_vmem [thread:$0]  (!%p1684_p13), %s244_s0, 64, %s246_s20, [#allocation11]  }
  0x25   : > { %1550 = dma.done.wait (%p1295_p10), [#allocation5], 64  }
  0x26   : > { %1552 = vsyncadd (%p1295_p10), [#allocation5], 4294967232 }
  0x27   : > { %1554 = dma.done.wait (%p1295_p10), [#allocation8], 4112  }
  0x28   : > { %1556 = vsyncadd (%p1295_p10), [#allocation8], 4294963184 }
  0x29   : > { %1558 = dma.done.wait (%p1295_p10), [#allocation11], 4160  }
  0x2a   : > { %1560 = vsyncadd (%p1295_p10), [#allocation11], 4294963136  ;;  %s304_s0 = sand.u32 1, %s1571_s22   ;;  %309 = sbr.rel (%p954_p9) target bundleno = 223 (0xdf), region = 68 }
  0x2b   : > { %s1727_s1 = scalar_lea.vmem [#allocation13], %s304_s0 }
  0x2f   : > { %v1080_v0 = vld [vmem:[#allocation9 + $0xe0] sm:$0xf]  ;;  %v1226_v1 = vld [vmem:[#allocation9 + $0xec] sm:$0xf0]  ;;  %v1224_v2 = vld [vmem:[#allocation9 + $0xe4] sm:$0xf] }
  0x30   : > { %v1081_v3 = vor.u32 %v1226_v1, %v1080_v0  ;;  %v1082_v4 = vld [vmem:[#allocation9 + $0xf0] sm:$0xf0]  ;;  %v1088_v5 = vld [vmem:[#allocation9 + $0xe8] sm:$0xf]  ;;  %v1227_v6 = vld [vmem:[#allocation9 + $0xf4] sm:$0xf0] }
  0x31   : > { %v1085_v7 = vor.u32 %v1224_v2, %v1082_v4  ;;  %v1089_v8 = vor.u32 %v1227_v6, %v1088_v5  ;;  %v1225_v9 = vld [vmem:[#allocation9 + $0xec] sm:$0xf]  ;;  %v1090_v10 = vld [vmem:[#allocation9 + $0xf8] sm:$0xf0]  ;;  %v1064_v11 = vld [vmem:[#allocation9 + $0xc0] sm:$0xf] }
  0x32   : > { %513 = vmatpush.bf16.msra.mxu0 %v1081_v3  ;;  %v1093_v12 = vor.u32 %v1225_v9, %v1090_v10  ;;  %v1222_v13 = vld [vmem:[#allocation9 + $0xcc] sm:$0xf0]  ;;  %v1220_v14 = vld [vmem:[#allocation9 + $0xc4] sm:$0xf]  ;;  %v1066_v15 = vld [vmem:[#allocation9 + $0xd0] sm:$0xf0] }
  0x33   : > { %526 = vmatpush.bf16.msra.mxu1 %v1085_v7  ;;  %539 = vmatpush.bf16.msra.mxu2 %v1089_v8  ;;  %v1065_v16 = vor.u32 %v1222_v13, %v1064_v11  ;;  %v1069_v17 = vor.u32 %v1220_v14, %v1066_v15  ;;  %v1072_v18 = vld [vmem:[#allocation9 + $0xc8] sm:$0xf]  ;;  %v1223_v19 = vld [vmem:[#allocation9 + $0xd4] sm:$0xf0]  ;;  %v1221_v20 = vld [vmem:[#allocation9 + $0xcc] sm:$0xf] }
  0x34   : > { %552 = vmatpush.bf16.msra.mxu3 %v1093_v12  ;;  %v1073_v21 = vor.u32 %v1223_v19, %v1072_v18  ;;  %v1074_v22 = vld [vmem:[#allocation9 + $0xd8] sm:$0xf0]  ;;  %v1048_v23 = vld [vmem:[#allocation9 + $0xa0] sm:$0xf]  ;;  %v1218_v24 = vld [vmem:[#allocation9 + $0xac] sm:$0xf0] }
  0x35   : > { %v1077_v25 = vor.u32 %v1221_v20, %v1074_v22  ;;  %v1216_v26 = vld [vmem:[#allocation9 + $0xa4] sm:$0xf]  ;;  %v1050_v27 = vld [vmem:[#allocation9 + $0xb0] sm:$0xf0]  ;;  %v1056_v28 = vld [vmem:[#allocation9 + $0xa8] sm:$0xf]  ;;  %v1049_v29 = vor.u32 %v1218_v24, %v1048_v23 }
  0x36   : > { %514 = vmatpush.bf16.msra.mxu0 %v1065_v16  ;;  %v1219_v30 = vld [vmem:[#allocation9 + $0xb4] sm:$0xf0]  ;;  %v1217_v31 = vld [vmem:[#allocation9 + $0xac] sm:$0xf]  ;;  %v1058_v32 = vld [vmem:[#allocation9 + $0xb8] sm:$0xf0]  ;;  %v1053_v33 = vor.u32 %v1216_v26, %v1050_v27 }
  0x37   : > { %527 = vmatpush.bf16.msra.mxu1 %v1069_v17  ;;  %540 = vmatpush.bf16.msra.mxu2 %v1073_v21  ;;  %v1057_v34 = vor.u32 %v1219_v30, %v1056_v28  ;;  %v1032_v35 = vld [vmem:[#allocation9 + $0x80] sm:$0xf]  ;;  %v1214_v36 = vld [vmem:[#allocation9 + $0x8c] sm:$0xf0]  ;;  %v1212_v37 = vld [vmem:[#allocation9 + $0x84] sm:$0xf]  ;;  %v1061_v38 = vor.u32 %v1217_v31, %v1058_v32 }
  0x38   : > { %553 = vmatpush.bf16.msra.mxu3 %v1077_v25  ;;  %v1034_v39 = vld [vmem:[#allocation9 + $0x90] sm:$0xf0]  ;;  %v1040_v40 = vld [vmem:[#allocation9 + $0x88] sm:$0xf]  ;;  %v1215_v41 = vld [vmem:[#allocation9 + $0x94] sm:$0xf0]  ;;  %v1033_v44 = vor.u32 %v1214_v36, %v1032_v35 }
  0x39   : > { %v1213_v42 = vld [vmem:[#allocation9 + $0x8c] sm:$0xf]  ;;  %v1042_v43 = vld [vmem:[#allocation9 + $0x98] sm:$0xf0]  ;;  %v1037_v45 = vor.u32 %v1212_v37, %v1034_v39  ;;  %v1041_v46 = vor.u32 %v1215_v41, %v1040_v40  ;;  %v1016_v47 = vld [vmem:[#allocation9 + $0x60] sm:$0xf] }
  0x3a   : > { %515 = vmatpush.bf16.msra.mxu0 %v1049_v29  ;;  %v1210_v48 = vld [vmem:[#allocation9 + $0x6c] sm:$0xf0]  ;;  %v1208_v49 = vld [vmem:[#allocation9 + $0x64] sm:$0xf]  ;;  %v1045_v50 = vor.u32 %v1213_v42, %v1042_v43  ;;  %v1018_v51 = vld [vmem:[#allocation9 + $0x70] sm:$0xf0] }
  0x3b   : > { %528 = vmatpush.bf16.msra.mxu1 %v1053_v33  ;;  %541 = vmatpush.bf16.msra.mxu2 %v1057_v34  ;;  %v1024_v52 = vld [vmem:[#allocation9 + $0x68] sm:$0xf]  ;;  %v1211_v53 = vld [vmem:[#allocation9 + $0x74] sm:$0xf0]  ;;  %v1209_v54 = vld [vmem:[#allocation9 + $0x6c] sm:$0xf]  ;;  %v1017_v56 = vor.u32 %v1210_v48, %v1016_v47  ;;  %v1021_v57 = vor.u32 %v1208_v49, %v1018_v51 }
  0x3c   : > { %554 = vmatpush.bf16.msra.mxu3 %v1061_v38  ;;  %v1026_v55 = vld [vmem:[#allocation9 + $0x78] sm:$0xf0]  ;;  %v1025_v58 = vor.u32 %v1211_v53, %v1024_v52  ;;  %v1000_v59 = vld [vmem:[#allocation9 + $0x40] sm:$0xf]  ;;  %v1206_v60 = vld [vmem:[#allocation9 + $0x4c] sm:$0xf0] }
  0x3d   : > { %v1204_v61 = vld [vmem:[#allocation9 + $0x44] sm:$0xf]  ;;  %v1029_v62 = vor.u32 %v1209_v54, %v1026_v55  ;;  %v1002_v63 = vld [vmem:[#allocation9 + $0x50] sm:$0xf0]  ;;  %v1008_v0 = vld [vmem:[#allocation9 + $0x48] sm:$0xf]  ;;  %v1001_v4 = vor.u32 %v1206_v60, %v1000_v59 }
  0x3e   : > { %516 = vmatpush.bf16.msra.mxu0 %v1033_v44  ;;  %v1207_v1 = vld [vmem:[#allocation9 + $0x54] sm:$0xf0]  ;;  %v1205_v2 = vld [vmem:[#allocation9 + $0x4c] sm:$0xf]  ;;  %v1010_v3 = vld [vmem:[#allocation9 + $0x58] sm:$0xf0]  ;;  %v1005_v5 = vor.u32 %v1204_v61, %v1002_v63 }
  0x3f   : > { %529 = vmatpush.bf16.msra.mxu1 %v1037_v45  ;;  %542 = vmatpush.bf16.msra.mxu2 %v1041_v46  ;;  %v1009_v6 = vor.u32 %v1207_v1, %v1008_v0  ;;  %v984_v7 = vld [vmem:[#allocation9 + $0x20] sm:$0xf]  ;;  %v1202_v8 = vld [vmem:[#allocation9 + $0x2c] sm:$0xf0]  ;;  %v1200_v9 = vld [vmem:[#allocation9 + $0x24] sm:$0xf]  ;;  %v1013_v10 = vor.u32 %v1205_v2, %v1010_v3 }
  0x40   : > { %555 = vmatpush.bf16.msra.mxu3 %v1045_v50  ;;  %v986_v11 = vld [vmem:[#allocation9 + $0x30] sm:$0xf0]  ;;  %v992_v12 = vld [vmem:[#allocation9 + $0x28] sm:$0xf]  ;;  %v1203_v13 = vld [vmem:[#allocation9 + $0x34] sm:$0xf0]  ;;  %v985_v16 = vor.u32 %v1202_v8, %v984_v7 }
  0x41   : > { %v1201_v14 = vld [vmem:[#allocation9 + $0x2c] sm:$0xf]  ;;  %v994_v15 = vld [vmem:[#allocation9 + $0x38] sm:$0xf0]  ;;  %v989_v17 = vor.u32 %v1200_v9, %v986_v11  ;;  %v993_v18 = vor.u32 %v1203_v13, %v992_v12  ;;  %v968_v19 = vld [vmem:[#allocation9] sm:$0xf] }
  0x42   : > { %517 = vmatpush.bf16.msra.mxu0 %v1017_v56  ;;  %v1198_v20 = vld [vmem:[#allocation9 + $0xc] sm:$0xf0]  ;;  %v1196_v21 = vld [vmem:[#allocation9 + $0x4] sm:$0xf]  ;;  %v997_v22 = vor.u32 %v1201_v14, %v994_v15  ;;  %v970_v23 = vld [vmem:[#allocation9 + $0x10] sm:$0xf0] }
  0x43   : > { %530 = vmatpush.bf16.msra.mxu1 %v1021_v57  ;;  %543 = vmatpush.bf16.msra.mxu2 %v1025_v58  ;;  %v976_v24 = vld [vmem:[#allocation9 + $0x8] sm:$0xf]  ;;  %v1199_v25 = vld [vmem:[#allocation9 + $0x14] sm:$0xf0]  ;;  %v1197_v26 = vld [vmem:[#allocation9 + $0xc] sm:$0xf]  ;;  %v969_v28 = vor.u32 %v1198_v20, %v968_v19  ;;  %v973_v29 = vor.u32 %v1196_v21, %v970_v23 }
  0x44   : > { %556 = vmatpush.bf16.msra.mxu3 %v1029_v62  ;;  %v978_v27 = vld [vmem:[#allocation9 + $0x18] sm:$0xf0]  ;;  %v977_v30 = vor.u32 %v1199_v25, %v976_v24  ;;  %v343_v34 = vld [vmem:[#allocation12] sm:$0xf] }
  0x45   : > { %v981_v31 = vor.u32 %v1197_v26, %v978_v27  ;;  %v310_v32 = vld [vmem:[#allocation4] sm:$0xf]  ;;  %v569_v33 = vld [vmem:[#allocation7] sm:$0x1]  ;;  %v345_v35 = vperm.slane %v343_v34, 0  ;;  %v346_v36 = vperm.slane %v343_v34, 1 }
  0x46   : > { %518 = vmatpush.bf16.msra.mxu0 %v1001_v4  ;;  %570 = vst [vmem:[#allocation2] sm:$0x1] %v569_v33  ;;  %v347_v41 = vperm.slane %v343_v34, 2  ;;  %v348_v42 = vperm.slane %v343_v34, 3 }
  0x47   : > { %531 = vmatpush.bf16.msra.mxu1 %v1005_v5  ;;  %544 = vmatpush.bf16.msra.mxu2 %v1009_v6 }
  0x48   : > { %557 = vmatpush.bf16.msra.mxu3 %v1013_v10 }
  0x4a   : > { %519 = vmatpush.bf16.msra.mxu0 %v985_v16 }
  0x4b   : > { %532 = vmatpush.bf16.msra.mxu1 %v989_v17  ;;  %545 = vmatpush.bf16.msra.mxu2 %v993_v18 }
  0x4c   : > { %558 = vmatpush.bf16.msra.mxu3 %v997_v22 }
  0x4e   : > { %520 = vmatpush.bf16.msra.mxu0 %v969_v28 }
  0x4f   : > { %533 = vmatpush.bf16.msra.mxu1 %v973_v29  ;;  %546 = vmatpush.bf16.msra.mxu2 %v977_v30 }
  0x50   : > { %559 = vmatpush.bf16.msra.mxu3 %v981_v31 }
  0x51   : > { %521 = vmatmul.bf16.vlgmr.msra.gmra.mxu0 %v310_v32 }
  0x52   : > { %534 = vmatmul.bf16.vlgmr.msra.gmra.mxu1 %v310_v32  ;;  %547 = vmatmul.bf16.vlgmr.msra.gmra.mxu2 %v310_v32 }
  0x53   : > { %560 = vmatmul.bf16.vlgmr.msra.gmra.mxu3 %v310_v32 }
  0xce   : > { %v522_v37 = vpop.f32.mrf.mxu0 }
  0xcf   : > { %v523_v38 = vadd.f32 %v522_v37, %v345_v35  ;;  %v535_v39 = vpop.f32.mrf.mxu1 }
  0xd0   : > { %v536_v40 = vadd.f32 %v535_v39, %v346_v36 }
  0xd1   : > { %565 = vst [vmem:[#allocation3] sm:$0xff] %v523_v38 }
  0xd2   : > { %566 = vst [vmem:[#allocation3 + $0x8] sm:$0xff] %v536_v40 }
  0xd5   : > { %v548_v43 = vpop.f32.mrf.mxu2 }
  0xd6   : > { %v549_v44 = vadd.f32 %v548_v43, %v347_v41  ;;  %v561_v45 = vpop.f32.mrf.mxu3  ;;  %v524_v46 = vpop.f32.mrf.mxu0 }
  0xd7   : > { %v562_v47 = vadd.f32 %v561_v45, %v348_v42  ;;  %v537_v48 = vpop.f32.mrf.mxu1 }
  0xd8   : > { %567 = vst [vmem:[#allocation3 + $0x10] sm:$0xff] %v549_v44 }
  0xd9   : > { %568 = vst [vmem:[#allocation3 + $0x18] sm:$0xff] %v562_v47 }
  0xdd   : > { %v550_v49 = vpop.f32.mrf.mxu2 }
  0xde   : > { %v563_v50 = vpop.f32.mrf.mxu3 }
  0xdf PF: > { %v1182_v51 = vld [vmem:[#allocation10 + $0xe0] sm:$0xf]  ;;  %v1251_v52 = vld [vmem:[#allocation10 + $0xec] sm:$0xf0]  ;;  %v1250_v53 = vld [vmem:[#allocation10 + $0xe4] sm:$0xf]  ;;  %s852_s14 = scalar_lea.hbm %s1782_s6, %s1644_s25 }
  0xe0   : > { %v1183_v54 = vor.u32 %v1251_v52, %v1182_v51  ;;  %v1184_v55 = vld [vmem:[#allocation10 + $0xf0] sm:$0xf0]  ;;  %v1170_v56 = vld [vmem:[#allocation10 + $0xc0] sm:$0xf]  ;;  %v1248_v57 = vld [vmem:[#allocation10 + $0xcc] sm:$0xf0] }
  0xe1   : > { %v1187_v58 = vor.u32 %v1250_v53, %v1184_v55  ;;  %v1247_v59 = vld [vmem:[#allocation10 + $0xc4] sm:$0xf]  ;;  %v1172_v60 = vld [vmem:[#allocation10 + $0xd0] sm:$0xf0]  ;;  %v1171_v61 = vor.u32 %v1248_v57, %v1170_v56  ;;  %v1158_v63 = vld [vmem:[#allocation10 + $0xa0] sm:$0xf] }
  0xe2   : > { %750 = vmatpush.bf16.msra.mxu0 %v1183_v54  ;;  %v1175_v62 = vor.u32 %v1247_v59, %v1172_v60  ;;  %v1245_v0 = vld [vmem:[#allocation10 + $0xac] sm:$0xf0]  ;;  %v1244_v1 = vld [vmem:[#allocation10 + $0xa4] sm:$0xf]  ;;  %v1160_v2 = vld [vmem:[#allocation10 + $0xb0] sm:$0xf0] }
  0xe3   : > { %763 = vmatpush.bf16.msra.mxu1 %v1187_v58  ;;  %v1190_v3 = vld [vmem:[#allocation10 + $0xe8] sm:$0xf]  ;;  %v1159_v4 = vor.u32 %v1245_v0, %v1158_v63  ;;  %v1252_v5 = vld [vmem:[#allocation10 + $0xf4] sm:$0xf0]  ;;  %v1163_v6 = vor.u32 %v1244_v1, %v1160_v2  ;;  %v1146_v7 = vld [vmem:[#allocation10 + $0x80] sm:$0xf] }
  0xe4   : > { %v1242_v8 = vld [vmem:[#allocation10 + $0x8c] sm:$0xf0]  ;;  %v1191_v9 = vor.u32 %v1252_v5, %v1190_v3  ;;  %v1178_v10 = vld [vmem:[#allocation10 + $0xc8] sm:$0xf]  ;;  %v1241_v11 = vld [vmem:[#allocation10 + $0x84] sm:$0xf] }
  0xe5   : > { %v1148_v12 = vld [vmem:[#allocation10 + $0x90] sm:$0xf0]  ;;  %v1249_v13 = vld [vmem:[#allocation10 + $0xd4] sm:$0xf0]  ;;  %v1147_v15 = vor.u32 %v1242_v8, %v1146_v7  ;;  %v1166_v16 = vld [vmem:[#allocation10 + $0xa8] sm:$0xf] }
  0xe6   : > { %751 = vmatpush.bf16.msra.mxu0 %v1171_v61  ;;  %776 = vmatpush.bf16.msra.mxu2 %v1191_v9  ;;  %v1179_v14 = vor.u32 %v1249_v13, %v1178_v10  ;;  %v1246_v17 = vld [vmem:[#allocation10 + $0xb4] sm:$0xf0]  ;;  %v1151_v18 = vor.u32 %v1241_v11, %v1148_v12  ;;  %v1134_v19 = vld [vmem:[#allocation10 + $0x60] sm:$0xf]  ;;  %v1239_v20 = vld [vmem:[#allocation10 + $0x6c] sm:$0xf0] }
  0xe7   : > { %764 = vmatpush.bf16.msra.mxu1 %v1175_v62  ;;  %v1238_v21 = vld [vmem:[#allocation10 + $0x64] sm:$0xf]  ;;  %v1136_v22 = vld [vmem:[#allocation10 + $0x70] sm:$0xf0]  ;;  %v1167_v23 = vor.u32 %v1246_v17, %v1166_v16  ;;  %v1135_v24 = vor.u32 %v1239_v20, %v1134_v19  ;;  %v1154_v25 = vld [vmem:[#allocation10 + $0x88] sm:$0xf] }
  0xe8   : > { %v1243_v26 = vld [vmem:[#allocation10 + $0x94] sm:$0xf0]  ;;  %v1139_v27 = vor.u32 %v1238_v21, %v1136_v22  ;;  %v1122_v28 = vld [vmem:[#allocation10 + $0x40] sm:$0xf]  ;;  %v1236_v29 = vld [vmem:[#allocation10 + $0x4c] sm:$0xf0] }
  0xe9   : > { %v1235_v30 = vld [vmem:[#allocation10 + $0x44] sm:$0xf]  ;;  %v1124_v31 = vld [vmem:[#allocation10 + $0x50] sm:$0xf0]  ;;  %v1155_v32 = vor.u32 %v1243_v26, %v1154_v25  ;;  %v1123_v33 = vor.u32 %v1236_v29, %v1122_v28  ;;  %v1142_v34 = vld [vmem:[#allocation10 + $0x68] sm:$0xf] }
  0xea   : > { %752 = vmatpush.bf16.msra.mxu0 %v1159_v4  ;;  %777 = vmatpush.bf16.msra.mxu2 %v1179_v14  ;;  %v1240_v35 = vld [vmem:[#allocation10 + $0x74] sm:$0xf0]  ;;  %v1127_v36 = vor.u32 %v1235_v30, %v1124_v31  ;;  %v1110_v37 = vld [vmem:[#allocation10 + $0x20] sm:$0xf]  ;;  %v1233_v38 = vld [vmem:[#allocation10 + $0x2c] sm:$0xf0] }
  0xeb   : > { %765 = vmatpush.bf16.msra.mxu1 %v1163_v6  ;;  %v1232_v39 = vld [vmem:[#allocation10 + $0x24] sm:$0xf]  ;;  %v1112_v40 = vld [vmem:[#allocation10 + $0x30] sm:$0xf0]  ;;  %v1143_v41 = vor.u32 %v1240_v35, %v1142_v34  ;;  %v1111_v42 = vor.u32 %v1233_v38, %v1110_v37  ;;  %v1130_v43 = vld [vmem:[#allocation10 + $0x48] sm:$0xf] }
  0xec   : > { %v1237_v44 = vld [vmem:[#allocation10 + $0x54] sm:$0xf0]  ;;  %v1115_v45 = vor.u32 %v1232_v39, %v1112_v40  ;;  %v1098_v46 = vld [vmem:[#allocation10] sm:$0xf]  ;;  %v1230_v47 = vld [vmem:[#allocation10 + $0xc] sm:$0xf0] }
  0xed   : > { %v1229_v48 = vld [vmem:[#allocation10 + $0x4] sm:$0xf]  ;;  %v1100_v49 = vld [vmem:[#allocation10 + $0x10] sm:$0xf0]  ;;  %v1131_v50 = vor.u32 %v1237_v44, %v1130_v43  ;;  %v1099_v51 = vor.u32 %v1230_v47, %v1098_v46  ;;  %v1731_v52 = vld [vmem:[#allocation2] sm:$0x1] }
  0xee   : > { %753 = vmatpush.bf16.msra.mxu0 %v1147_v15  ;;  %778 = vmatpush.bf16.msra.mxu2 %v1167_v23  ;;  %v1118_v53 = vld [vmem:[#allocation10 + $0x28] sm:$0xf]  ;;  %v1234_v54 = vld [vmem:[#allocation10 + $0x34] sm:$0xf0]  ;;  %v1103_v55 = vor.u32 %v1229_v48, %v1100_v49  ;;  %v581_v56 = vpack.c.bf16 %v1731_v52, %v1731_v52  ;;  %s572_s9 = sshra.s32 %s1644_s25, 3  ;;  %s575_s15 = sand.u32 7, %s1644_s25 }
  0xef   : > { %766 = vmatpush.bf16.msra.mxu1 %v1151_v18  ;;  %v1119_v57 = vor.u32 %v1234_v54, %v1118_v53  ;;  %v1106_v58 = vld [vmem:[#allocation10 + $0x8] sm:$0xf]  ;;  %v1231_v59 = vld [vmem:[#allocation10 + $0x14] sm:$0xf0]  ;;  %s1228_s29 = sshll.u32 %s572_s9, 5  ;;  %s854_s19 = sshll.u32 %s1727_s1, 4  ;;  %s855_s19 = int_to_ptr.vmem [resolvable:$true] %s854_s19 }
  0xf0   : > { %v1107_v60 = vor.u32 %v1231_v59, %v1106_v58  ;;  %s578_s10 = sadd.s32 %s1228_s29, %s575_s15  ;;  %v614_v61 = vld [vmem:[%s1781_s5] sm:$0xf]  ;;  %s856_s26 = sshll.u32 %s852_s14, 4  ;;  %s857_s26 = int_to_ptr.hbm [resolvable:$true] %s856_s26 }
  0xf1   : > { %s579_s16 = scalar_lea.vmem [#allocation3], %s578_s10  ;;  %v744_v63 = vperm.slane %v614_v61, 0  ;;  %v745_v0 = vperm.slane %v614_v61, 1  ;;  %v746_v22 = vperm.slane %v614_v61, 2  ;;  %s844_s28 = scalar_lea.sflag [#allocation6], %s304_s0 }
  0xf2   : > { %754 = vmatpush.bf16.msra.mxu0 %v1135_v24  ;;  %779 = vmatpush.bf16.msra.mxu2 %v1155_v32  ;;  %v580_v62 = vld [vmem:[%s579_s16] ss:$8 sm:$0xf]  ;;  %s1519_s18 = sshra.s32 %s857_s26, 4  ;;  %s1525_s15 = scalar_lea.hbm %s1782_s6, 6  ;;  %s1520_s18 = int_to_ptr.hbm [resolvable:$true] %s1519_s18 }
  0xf3   : > { %767 = vmatpush.bf16.msra.mxu1 %v1139_v27  ;;  %v810_v2 = vrot.slane %v580_v62, 1  ;;  %s1521_s20 = scalar_lea.hbm %s1520_s18, 1  ;;  %p1526_p3 = scmp.lt.s32.totalorder %s1520_s18, %s1782_s6 }
  0xf4   : > { %p1522_p0 = scmp.ne.s32.totalorder %s1520_s18, %s1521_s20  ;;  %p1527_p4 = scmp.lt.s32.totalorder %s1525_s15, %s1521_s20 }
  0xf6   : > { %755 = vmatpush.bf16.msra.mxu0 %v1123_v33  ;;  %780 = vmatpush.bf16.msra.mxu2 %v1143_v41  ;;  %v833_v33 = vrot.slane %v580_v62, 2  ;;  %p1523_p1 = pnand %p1522_p0, %p1661_p5  ;;  %p1528_p7 = por %p1527_p4, %p1526_p3 }
  0xf7   : > { %768 = vmatpush.bf16.msra.mxu1 %v1127_v36 }
  0xf8   : > { %p1524_p2 = pneg %p1523_p1 }
  0xfa   : > { %756 = vmatpush.bf16.msra.mxu0 %v1111_v42  ;;  %781 = vmatpush.bf16.msra.mxu2 %v1131_v50  ;;  %p1529_p8 = pnand %p1528_p7, %p1524_p2 }
  0xfb   : > { %769 = vmatpush.bf16.msra.mxu1 %v1115_v45 }
  0xfe   : > { %757 = vmatpush.bf16.msra.mxu0 %v1099_v51  ;;  %782 = vmatpush.bf16.msra.mxu2 %v1119_v57 }
  0xff   : > { %770 = vmatpush.bf16.msra.mxu1 %v1103_v55 }
 0x101   : > { %758 = vmatmul.bf16.vlgmr.msra.gmra.mxu0 %v581_v56 }
 0x102   : > { %771 = vmatmul.bf16.vlgmr.msra.gmra.mxu1 %v581_v56  ;;  %783 = vmatpush.bf16.msra.mxu2 %v1107_v60 }
 0x105   : > { %784 = vmatmul.bf16.vlgmr.msra.gmra.mxu2 %v581_v56 }
 0x17e   : > { %v759_v1 = vpop.f32.mrf.mxu0 }
 0x17f   : > { %v760_v3 = vadd.f32 %v759_v1, %v744_v63  ;;  %v772_v4 = vpop.f32.mrf.mxu1 }
 0x180   : > { %v773_v5 = vadd.f32 %v772_v4, %v745_v0 }
 0x181   : > { %v789_v6 = vadd.f32 %v760_v3, %v580_v62 }
 0x182   : > { %v812_v7 = vadd.f32 %v810_v2, %v773_v5 }
 0x183   : > { %v1192_v8 = vmul.f32 -1.442695, %v789_v6 }
 0x184   : > { %v1193_v9 = vmul.f32 -1.442695, %v812_v7 }
 0x185   : > { %1345 = vpow2.f32 %v1192_v8 }
 0x186   : > { %1347 = vpow2.f32 %v1193_v9  ;;  %v761_v10 = vpop.f32.mrf.mxu0 }
 0x187   : > { %v774_v11 = vpop.f32.mrf.mxu1 }
 0x188   : > { %v785_v13 = vpop.f32.mrf.mxu2 }
 0x189   : > { %v786_v29 = vadd.f32 %v785_v13, %v746_v22 }
 0x18b   : > { %v1346_v12 = vpop.eup %1345 }
 0x18c   : > { %v1348_v14 = vpop.eup %1347  ;;  %v793_v15 = vadd.f32 1.0, %v1346_v12 }
 0x18d   : > { %v816_v16 = vadd.f32 1.0, %v1348_v14 }
 0x18e   : > { %1349 = vrcp.f32 %v793_v15  ;;  %v805_v25 = vand.u32 2147483648, %v793_v15  ;;  %v803_v27 = vand.u32 2147483647, %v793_v15  ;;  %vm799_vm1 = vweird.f32 %v793_v15 }
 0x18f   : > { %1351 = vrcp.f32 %v816_v16  ;;  %vm822_vm4 = vweird.f32 %v816_v16  ;;  %v828_v37 = vand.u32 2147483648, %v816_v16  ;;  %v826_v38 = vand.u32 2147483647, %v816_v16 }
 0x190   : > { %v787_v17 = vpop.f32.mrf.mxu2  ;;  %v806_v31 = vor.u32 1.1754944e-38, %v805_v25  ;;  %vm804_vm3 = vcmp.eq.f32.partialorder %v803_v27, 8.507059e+37 }
 0x191   : > { %v829_v41 = vor.u32 1.1754944e-38, %v828_v37  ;;  %vm827_vm7 = vcmp.eq.f32.partialorder %v826_v38, 8.507059e+37 }
 0x194   : > { %v1350_v18 = vpop.eup %1349 }
 0x195   : > { %v1352_v19 = vpop.eup %1351  ;;  %v795_v20 = vmul.f32 %v1350_v18, %v793_v15  ;;  %vm800_vm0 = vweird.f32 %v1350_v18 }
 0x196   : > { %v818_v21 = vmul.f32 %v1352_v19, %v816_v16  ;;  %vm801_vm2 = vmor %vm799_vm1, %vm800_vm0  ;;  %vm823_vm5 = vweird.f32 %v1352_v19 }
 0x197   : > { %v796_v23 = vsub.f32 1.0, %v795_v20  ;;  %vm824_vm6 = vmor %vm822_vm4, %vm823_vm5 }
 0x198   : > { %v819_v24 = vsub.f32 1.0, %v818_v21 }
 0x199   : > { %v797_v26 = vmul.f32 %v1350_v18, %v796_v23 }
 0x19a   : > { %v820_v28 = vmul.f32 %v1352_v19, %v819_v24 }
 0x19b   : > { %v798_v30 = vadd.f32 %v1350_v18, %v797_v26 }
 0x19c   : > { %v821_v35 = vadd.f32 %v1352_v19, %v820_v28 }
 0x19d   : > { %v802_v32 = vsel %vm801_vm2, %v1350_v18, %v798_v30 }
 0x19e   : > { %v807_v34 = vsel %vm804_vm3, %v806_v31, %v802_v32  ;;  %v825_v40 = vsel %vm824_vm6, %v1352_v19, %v821_v35 }
 0x19f   : > { %v832_v36 = vmul.f32 %v807_v34, %v786_v29  ;;  %v830_v42 = vsel %vm827_vm7, %v829_v41, %v825_v40 }
 0x1a0   : > { %v837_v43 = vsub.f32 1.0, %v830_v42  ;;  %v839_v46 = vmul.f32 %v830_v42, %v1731_v52 }
 0x1a1   : > { %v835_v39 = vadd.f32 %v833_v33, %v832_v36 }
 0x1a3   : > { %1353 = vtanh.f32 %v835_v39 }
 0x1a9   : > { %v1354_v44 = vpop.eup %1353 }
 0x1aa   : > { %v838_v45 = vmul.f32 %v1354_v44, %v837_v43 }
 0x1ac   : > { %v840_v47 = vadd.f32 %v839_v46, %v838_v45 }
 0x1ae   : > { %841 = vst [vmem:[#allocation2] sm:$0x1] %v840_v47 }
 0x1af   : > { %842 = vst [vmem:[%s1727_s1] sm:$0x1] %v840_v47 }
 0x1b0   : > { %1532 = shalt.err (!%p1529_p8)
}
 0x1b1   : > { %1273 = dma.vmem_to_hbm [thread:$0]  (%p1661_p5), %s855_s19, 16, %s857_s26, %s844_s28  }
 0x1b2 PF: > { %p1305_p9 = scmp.ge.s32.totalorder %s1579_s24, 2  ;;  %s868_s0 = sand.u32 1, %s1567_s21  }
 0x1b3   : > { %s869_s1 = scalar_lea.sflag [#allocation6], %s868_s0 }
 0x1b4   : > { %p1292_p10 = pnand %p1305_p9, %p1665_p6 }
 0x1b6   : > { %p1293_p11 = pneg %p1292_p10 }
 0x1b8   : > { %1562 = dma.done.wait (%p1293_p11), %s869_s1, 16  }
 0x1b9   : > { %1564 = vsyncadd (%p1293_p11), %s869_s1, 4294967280  ;;  %p19_p12 = scmp.ge.s32.totalorder %s1648_s27, 8   ;;  %s1791_s21 = smov %s1571_s22 }
 0x1ba   : > { %s1792_s22 = smov %s1575_s23  ;;  %s1793_s23 = smov %s1659_s30 }
 0x1bb   : > { %s1794_s24 = smov %s1648_s27  ;;  %21 = sbr.rel (!%p19_p12) target bundleno = 9 (0x9), region = 102 }
 0x1c0   :  { %874 = vsyncpa [#allocation5], 1 }
 0x1c1   :  { %876 = vsyncpa [#allocation5 + $0x1], 1 }
 0x1c2   :  { %877 = vsyncpa [#allocation8], 1 }
 0x1c3   :  { %878 = vsyncpa [#allocation11], 1 }
 0x1c4   :  { %879 = vsyncpa [#allocation6], 1 }
 0x1c5   :  { %881 = vsyncpa [#allocation6 + $0x1], 1 }

</bundles_post_ra>
